<compile_context>
chip_gen: v5e
topology: v5e:2x2
jax: 0.10.0
libtpu: 0.0.40
codegen_flags: <defaults>
</compile_context>

<pallas_src>
import numpy as np
import jax
import jax.numpy as jnp
from jax import lax
from jax.experimental import pallas as pl
from jax.experimental.pallas import tpu as pltpu


def _round_up(x, m):
    return ((x + m - 1) // m) * m


# Default negatives-tile size (rows of zall streamed per reduction step).
# With f32 D-dim rows and double-buffering this stays far below the scoped
# VMEM budget on every generation (v5e/v6e 128 MiB, v7x 64 MiB); shrink it if
# D grows large.
TILE_N_ROWS = 512


# ----------------------------------------------------------------------------
# Pallas kernel
#   grid = (num_steps, N_pad // tile_n)
#   scalar prefetch : n_common (num_steps,), n_neg (num_steps,)   [SMEM]
#   za   : (num_steps, n_pad, D)  anchor rows (pre-linear), zero padded
#   zp   : (num_steps, n_pad, D)  positive rows, zero padded
#   zall : (num_steps, N_pad, D)  full negatives, zero padded, streamed tiles
#   wT   : (D, D)   linear weight transposed (x @ wT == x @ W.T)
#   b    : (1, D)   linear bias
#   out  : (num_steps, 1, 128)    per-step loss broadcast across lanes
# ----------------------------------------------------------------------------
def _contrastive_kernel(n_common_ref, n_neg_ref,              # scalar prefetch
                        za_ref, zp_ref, zall_ref, wT_ref, b_ref,
                        out_ref,
                        z1_sc, pos_sc, negsum_sc):
    t = pl.program_id(0)          # time step (parallel)
    k = pl.program_id(1)          # negatives tile (reduction)
    nk = pl.num_programs(1)
    tile_n = zall_ref.shape[1]

    # ---- once per time step: anchor linear + normalization + positive sim ----
    @pl.when(k == 0)
    def _init():
        za = za_ref[0].astype(jnp.float32)            # (n_pad, D)
        zp = zp_ref[0].astype(jnp.float32)            # (n_pad, D)
        wT = wT_ref[...].astype(jnp.float32)          # (D, D)
        b = b_ref[...].astype(jnp.float32)            # (1, D)
        anchor = jnp.dot(za, wT, preferred_element_type=jnp.float32) + b
        # F.normalize(x, dim=-1): x * rsqrt(max(sum(x^2), 1e-24))
        #                       == x / max(||x||_2, 1e-12)
        inv_a = lax.rsqrt(jnp.maximum(jnp.sum(anchor * anchor, axis=-1,
                                              keepdims=True), 1e-24))
        inv_p = lax.rsqrt(jnp.maximum(jnp.sum(zp * zp, axis=-1,
                                              keepdims=True), 1e-24))
        z1 = anchor * inv_a
        z2 = zp * inv_p
        z1_sc[...] = z1
        pos_sc[...] = jnp.sum(z1 * z2, axis=-1, keepdims=True)
        negsum_sc[...] = jnp.zeros_like(negsum_sc)

    # ---- streamed negatives tile: normalize rows (rsqrt), sim on MXU ----
    zn = zall_ref[0].astype(jnp.float32)              # (tile_n, D)
    inv_n = lax.rsqrt(jnp.maximum(jnp.sum(zn * zn, axis=-1, keepdims=True),
                                  1e-24))             # (tile_n, 1)
    zn_n = zn * inv_n
    # (n_pad, D) x (tile_n, D) contracted on D  -> (n_pad, tile_n)
    sim = lax.dot_general(z1_sc[...], zn_n,
                          dimension_numbers=(((1,), (1,)), ((), ())),
                          preferred_element_type=jnp.float32)
    # Mask padded negative columns (global column index >= n_neg[t]).
    col = lax.broadcasted_iota(jnp.int32, sim.shape, 1) + k * tile_n
    valid = col < n_neg_ref[t]
    # exp without max-subtraction is safe: cosine similarities are in [-1, 1].
    negsum_sc[...] += jnp.sum(jnp.where(valid, jnp.exp(sim), 0.0),
                              axis=-1, keepdims=True)

    # ---- finalize: -log(exp(pos)/neg_sum) = log(neg_sum) - pos ; masked mean ----
    @pl.when(k == nk - 1)
    def _finalize():
        loss_rows = jnp.log(negsum_sc[...]) - pos_sc[...]   # (n_pad, 1)
        row = lax.broadcasted_iota(jnp.int32, loss_rows.shape, 0)
        nc = n_common_ref[t]
        masked = jnp.where(row < nc, loss_rows, 0.0)
        loss = jnp.sum(masked) / nc.astype(jnp.float32)
        out_ref[...] = jnp.zeros(out_ref.shape, out_ref.dtype) + loss


def contrastive_steps(n_common, n_neg, za, zp, zall, wT, b2, tile_n):
    """Run every (non-empty) contrastive time step through one pallas_call."""
    num_steps, n_pad, D = za.shape
    N_pad = zall.shape[1]
    assert N_pad % tile_n == 0
    nk = N_pad // tile_n

    out = pl.pallas_call(
        _contrastive_kernel,
        out_shape=jax.ShapeDtypeStruct((num_steps, 1, 128), jnp.float32),
        grid_spec=pltpu.PrefetchScalarGridSpec(
            num_scalar_prefetch=2,
            grid=(num_steps, nk),
            in_specs=[
                pl.BlockSpec((1, n_pad, D), lambda t, k, nc, nn: (t, 0, 0)),
                pl.BlockSpec((1, n_pad, D), lambda t, k, nc, nn: (t, 0, 0)),
                pl.BlockSpec((1, tile_n, D), lambda t, k, nc, nn: (t, k, 0)),
                pl.BlockSpec((D, D), lambda t, k, nc, nn: (0, 0)),
                pl.BlockSpec((1, D), lambda t, k, nc, nn: (0, 0)),
            ],
            out_specs=pl.BlockSpec((1, 1, 128), lambda t, k, nc, nn: (t, 0, 0)),
            scratch_shapes=[
                pltpu.VMEM((n_pad, D), jnp.float32),   # z1 (normalized anchor)
                pltpu.VMEM((n_pad, 1), jnp.float32),   # positive cosine sim
                pltpu.VMEM((n_pad, 1), jnp.float32),   # running neg_sum
            ],
        ),
        compiler_params=pltpu.CompilerParams(
            dimension_semantics=("parallel", "arbitrary"),
            vmem_limit_bytes=32 * 1024 * 1024,
        ),
    )(n_common, n_neg, za, zp, zall, wT, b2)
    return out[:, 0, 0]


# ----------------------------------------------------------------------------
# Forward pass equivalent to Contrastive2.forward
# ----------------------------------------------------------------------------
def contrastive2_forward(all_z, all_node_idx, wT, b2, start_window,
                         tile_n_rows=TILE_N_ROWS):
    t_len = len(all_node_idx)
    s = t_len - 1
    denom = float(s - start_window)

    # Host-side data-dependent part: per-window set intersection + row gather.
    # TODO(synk): the set intersection over python lists of node ids has no
    # clean in-kernel equivalent; it stays on the host like in the module.
    nodes_s = set(np.asarray(all_node_idx[s]).tolist())
    steps = []
    for i in range(start_window, s):
        common = sorted(nodes_s & set(np.asarray(all_node_idx[i]).tolist()))
        if len(common) == 0:
            continue
        steps.append((i, np.asarray(common, dtype=np.int64)))
    if not steps:
        return jnp.float32(0.0)

    D = int(np.asarray(all_z[0]).shape[-1])
    num_steps = len(steps)
    max_n = max(len(c) for _, c in steps)
    n_pad = _round_up(max_n, 8)
    max_N = max(int(np.asarray(all_z[i]).shape[0]) for i, _ in steps)
    tile_n = min(int(tile_n_rows), _round_up(max_N, 8))
    tile_n = _round_up(tile_n, 8)
    N_pad = _round_up(max_N, tile_n)

    za = np.zeros((num_steps, n_pad, D), np.float32)
    zp = np.zeros((num_steps, n_pad, D), np.float32)
    zall = np.zeros((num_steps, N_pad, D), np.float32)
    n_common = np.zeros((num_steps,), np.int32)
    n_neg = np.zeros((num_steps,), np.int32)

    z_s = np.asarray(all_z[s])
    for j, (i, common) in enumerate(steps):
        zi = np.asarray(all_z[i])
        nc = len(common)
        za[j, :nc] = z_s[common]
        zp[j, :nc] = zi[common]
        zall[j, :zi.shape[0]] = zi
        n_common[j] = nc
        n_neg[j] = zi.shape[0]

    step_losses = contrastive_steps(
        jnp.asarray(n_common), jnp.asarray(n_neg),
        jnp.asarray(za), jnp.asarray(zp), jnp.asarray(zall),
        jnp.asarray(wT), jnp.asarray(b2), tile_n)

    # Same denominator as the PyTorch module (includes skipped windows).
    return jnp.sum(step_losses) / denom


# ----------------------------------------------------------------------------
# Pure-JAX reference (mirrors the PyTorch module) for a correctness check
# ----------------------------------------------------------------------------
def _reference_forward(all_z, all_node_idx, wT, b2, start_window):
    def l2norm(x):
        nrm = jnp.sqrt(jnp.sum(x * x, axis=-1, keepdims=True))
        return x / jnp.maximum(nrm, 1e-12)

    t_len = len(all_node_idx)
    s = t_len - 1
    nce = 0.0
    for i in range(start_window, s):
        common = sorted(set(np.asarray(all_node_idx[s]).tolist())
                        & set(np.asarray(all_node_idx[i]).tolist()))
        if len(common) == 0:
            continue
        common = jnp.asarray(common, dtype=jnp.int32)
        anchor = all_z[s][common] @ wT + b2[0]
        z1 = l2norm(anchor)
        z2 = l2norm(all_z[i][common])
        z3 = l2norm(all_z[i])
        pos_sim = jnp.exp(jnp.sum(z1 * z2, axis=-1, keepdims=True))
        neg_sim = jnp.sum(jnp.exp(z1 @ z3.T), axis=-1, keepdims=True)
        nce = nce + jnp.mean(-jnp.log(pos_sim / neg_sim))
    return nce / (s - start_window)


if __name__ == "__main__":
    # Synthetic config consistent with the module:
    #   hidden_size_HANLayer=8, num_heads_HANLayer=4 -> z_dim = 32
    #   window_size=2 -> start_window = 1
    #   t_len = 5 time steps, 40 nodes per step (exercises multi-tile reduce)
    D = 32
    N_TOTAL = 40
    T_LEN = 5
    START_WINDOW = 1

    key = jax.random.PRNGKey(0)
    k_w, k_b, k_z = jax.random.split(key, 3)

    # nn.Linear(z_dim, z_dim) params; the kernel takes W.T and (1, D) bias.
    W = jax.random.normal(k_w, (D, D), dtype=jnp.float32) * 0.1
    b = jax.random.normal(k_b, (D,), dtype=jnp.float32) * 0.1
    wT = W.T
    b2 = b.reshape(1, D)

    # all_z: list of (N_TOTAL, D) embeddings; all_node_idx: active node ids
    # (overlapping windows so each step has a different number of commons).
    zs = jax.random.normal(k_z, (T_LEN, N_TOTAL, D), dtype=jnp.float32)
    all_z = [zs[t] for t in range(T_LEN)]
    all_node_idx = [np.arange(t, t + 30, dtype=np.int32) for t in range(T_LEN)]

    # Small negatives tile so the demo actually exercises the tiled reduction
    # (grid k-axis > 1) and the padded-column masking.
    loss = contrastive2_forward(all_z, all_node_idx, wT, b2, START_WINDOW,
                                tile_n_rows=16)
    loss = jax.block_until_ready(loss)

    ref = _reference_forward(all_z, all_node_idx, wT, b2, START_WINDOW)
    ref = jax.block_until_ready(ref)

    np.testing.assert_allclose(np.asarray(loss), np.asarray(ref),
                               rtol=2e-4, atol=2e-4)
    assert np.isfinite(np.asarray(loss))

    print("KERNEL_OK")
</pallas_src>

<mosaic_0001>
module attributes {stable_mosaic.version = 11 : i64} {
  func.func @_contrastive_kernel(%arg0: i32, %arg1: i32, %arg2: memref<3xi32, #tpu.memory_space<smem>>, %arg3: memref<3xi32, #tpu.memory_space<smem>>, %arg4: memref<1x32x32xf32, #tpu.memory_space<vmem>>, %arg5: memref<1x32x32xf32, #tpu.memory_space<vmem>>, %arg6: memref<1x16x32xf32, #tpu.memory_space<vmem>>, %arg7: memref<32x32xf32, #tpu.memory_space<vmem>>, %arg8: memref<1x32xf32, #tpu.memory_space<vmem>>, %arg9: memref<1x1x128xf32, #tpu.memory_space<vmem>>, %arg10: memref<32x32xf32, #tpu.memory_space<vmem>>, %arg11: memref<32x1xf32, #tpu.memory_space<vmem>>, %arg12: memref<32x1xf32, #tpu.memory_space<vmem>>) attributes {dimension_semantics = [#tpu.dimension_semantics<parallel>, #tpu.dimension_semantics<arbitrary>], iteration_bounds = array<i64: 3, 3>, scalar_prefetch = 2 : i64, scratch_operands = 3 : i64, tpu.core_type = #tpu.core_type<tc>, window_params = [{transform_indices = @transform_0, window_bounds = array<i64: 1, 32, 32>}, {transform_indices = @transform_1, window_bounds = array<i64: 1, 32, 32>}, {transform_indices = @transform_2, window_bounds = array<i64: 1, 16, 32>}, {pipeline_mode = #tpu.pipeline_mode<synchronous>, transform_indices = @transform_3, window_bounds = array<i64: 32, 32>}, {pipeline_mode = #tpu.pipeline_mode<synchronous>, transform_indices = @transform_4, window_bounds = array<i64: 1, 32>}, {transform_indices = @transform_5, window_bounds = array<i64: 1, 1, 128>}]} {
    %c0_i32 = arith.constant 0 : i32
    %0 = arith.cmpi eq, %arg1, %c0_i32 : i32
    %1 = arith.extui %0 : i1 to i32
    %c0_i32_0 = arith.constant 0 : i32
    %2 = arith.cmpi ne, %1, %c0_i32_0 : i32
    scf.if %2 {
      %c0_14 = arith.constant 0 : index
      %c0_15 = arith.constant 0 : index
      %c0_16 = arith.constant 0 : index
      %34 = vector.load %arg4[%c0_14, %c0_15, %c0_16] : memref<1x32x32xf32, #tpu.memory_space<vmem>>, vector<1x32x32xf32>
      %35 = vector.shape_cast %34 : vector<1x32x32xf32> to vector<32x32xf32>
      %c0_17 = arith.constant 0 : index
      %c0_18 = arith.constant 0 : index
      %c0_19 = arith.constant 0 : index
      %36 = vector.load %arg5[%c0_17, %c0_18, %c0_19] : memref<1x32x32xf32, #tpu.memory_space<vmem>>, vector<1x32x32xf32>
      %37 = vector.shape_cast %36 : vector<1x32x32xf32> to vector<32x32xf32>
      %c0_20 = arith.constant 0 : index
      %c0_21 = arith.constant 0 : index
      %38 = vector.load %arg7[%c0_20, %c0_21] : memref<32x32xf32, #tpu.memory_space<vmem>>, vector<32x32xf32>
      %c0_22 = arith.constant 0 : index
      %c0_23 = arith.constant 0 : index
      %39 = vector.load %arg8[%c0_22, %c0_23] : memref<1x32xf32, #tpu.memory_space<vmem>>, vector<1x32xf32>
      %cst_24 = arith.constant dense<0.000000e+00> : vector<32x32xf32>
      %40 = tpu.matmul %35, %38, %cst_24 {dimension_numbers = #tpu.dot_dimension_numbers<[1], [0], [0], [1], [0, 0, 1, 1], [], []>} : vector<32x32xf32>, vector<32x32xf32>, vector<32x32xf32> -> vector<32x32xf32>
      %41 = vector.broadcast %39 : vector<1x32xf32> to vector<32x32xf32>
      %42 = arith.addf %40, %41 : vector<32x32xf32>
      %43 = arith.mulf %42, %42 : vector<32x32xf32>
      %cst_25 = arith.constant dense<0.000000e+00> : vector<32xf32>
      %44 = vector.multi_reduction <add>, %43, %cst_25 [1] : vector<32x32xf32> to vector<32xf32>
      %45 = vector.shape_cast %44 : vector<32xf32> to vector<32x1xf32>
      %cst_26 = arith.constant 1.000000e-24 : f32
      %46 = vector.broadcast %cst_26 : f32 to vector<32x1xf32>
      %47 = arith.maximumf %45, %46 : vector<32x1xf32>
      %48 = math.rsqrt %47 : vector<32x1xf32>
      %49 = arith.mulf %37, %37 : vector<32x32xf32>
      %cst_27 = arith.constant dense<0.000000e+00> : vector<32xf32>
      %50 = vector.multi_reduction <add>, %49, %cst_27 [1] : vector<32x32xf32> to vector<32xf32>
      %51 = vector.shape_cast %50 : vector<32xf32> to vector<32x1xf32>
      %cst_28 = arith.constant 1.000000e-24 : f32
      %52 = vector.broadcast %cst_28 : f32 to vector<32x1xf32>
      %53 = arith.maximumf %51, %52 : vector<32x1xf32>
      %54 = math.rsqrt %53 : vector<32x1xf32>
      %55 = vector.broadcast %48 : vector<32x1xf32> to vector<32x32xf32>
      %56 = arith.mulf %42, %55 : vector<32x32xf32>
      %57 = vector.broadcast %54 : vector<32x1xf32> to vector<32x32xf32>
      %58 = arith.mulf %37, %57 : vector<32x32xf32>
      %c0_29 = arith.constant 0 : index
      %c0_30 = arith.constant 0 : index
      %59 = vector.load %arg10[%c0_29, %c0_30] : memref<32x32xf32, #tpu.memory_space<vmem>>, vector<32x32xf32>
      tpu.vector_store %arg10[%c0_29, %c0_30], %56 {strides = array<i32>} : memref<32x32xf32, #tpu.memory_space<vmem>>, vector<32x32xf32>,
      %60 = arith.mulf %56, %58 : vector<32x32xf32>
      %cst_31 = arith.constant dense<0.000000e+00> : vector<32xf32>
      %61 = vector.multi_reduction <add>, %60, %cst_31 [1] : vector<32x32xf32> to vector<32xf32>
      %62 = vector.shape_cast %61 : vector<32xf32> to vector<32x1xf32>
      %c0_32 = arith.constant 0 : index
      %c0_33 = arith.constant 0 : index
      %63 = vector.load %arg11[%c0_32, %c0_33] : memref<32x1xf32, #tpu.memory_space<vmem>>, vector<32x1xf32>
      tpu.vector_store %arg11[%c0_32, %c0_33], %62 {strides = array<i32>} : memref<32x1xf32, #tpu.memory_space<vmem>>, vector<32x1xf32>,
      %cst_34 = arith.constant 0.000000e+00 : f32
      %64 = vector.broadcast %cst_34 : f32 to vector<32x1xf32>
      %c0_35 = arith.constant 0 : index
      %c0_36 = arith.constant 0 : index
      %65 = vector.load %arg12[%c0_35, %c0_36] : memref<32x1xf32, #tpu.memory_space<vmem>>, vector<32x1xf32>
      tpu.vector_store %arg12[%c0_35, %c0_36], %64 {strides = array<i32>} : memref<32x1xf32, #tpu.memory_space<vmem>>, vector<32x1xf32>,
    } else {
    }
    %c0 = arith.constant 0 : index
    %c0_1 = arith.constant 0 : index
    %c0_2 = arith.constant 0 : index
    %3 = vector.load %arg6[%c0, %c0_1, %c0_2] : memref<1x16x32xf32, #tpu.memory_space<vmem>>, vector<1x16x32xf32>
    %4 = vector.shape_cast %3 : vector<1x16x32xf32> to vector<16x32xf32>
    %5 = arith.mulf %4, %4 : vector<16x32xf32>
    %cst = arith.constant dense<0.000000e+00> : vector<16xf32>
    %6 = vector.multi_reduction <add>, %5, %cst [1] : vector<16x32xf32> to vector<16xf32>
    %7 = vector.shape_cast %6 : vector<16xf32> to vector<16x1xf32>
    %cst_3 = arith.constant 1.000000e-24 : f32
    %8 = vector.broadcast %cst_3 : f32 to vector<16x1xf32>
    %9 = arith.maximumf %7, %8 : vector<16x1xf32>
    %10 = math.rsqrt %9 : vector<16x1xf32>
    %11 = vector.broadcast %10 : vector<16x1xf32> to vector<16x32xf32>
    %12 = arith.mulf %4, %11 : vector<16x32xf32>
    %c0_4 = arith.constant 0 : index
    %c0_5 = arith.constant 0 : index
    %13 = vector.load %arg10[%c0_4, %c0_5] : memref<32x32xf32, #tpu.memory_space<vmem>>, vector<32x32xf32>
    %cst_6 = arith.constant dense<0.000000e+00> : vector<32x16xf32>
    %14 = tpu.matmul %13, %12, %cst_6 {dimension_numbers = #tpu.dot_dimension_numbers<[1], [1], [0], [0], [0, 0, 1, 0], [], []>} : vector<32x32xf32>, vector<16x32xf32>, vector<32x16xf32> -> vector<32x16xf32>
    %15 = tpu.iota {dimensions = array<i32: 1>} : vector<32x16xi32>
    %c16_i32 = arith.constant 16 : i32
    %16 = arith.muli %arg1, %c16_i32 : i32
    %17 = vector.broadcast %16 : i32 to vector<32x16xi32>
    %18 = arith.addi %15, %17 : vector<32x16xi32>
    %19 = arith.index_cast %arg0 : i32 to index
    %20 = memref.load %arg3[%19] : memref<3xi32, #tpu.memory_space<smem>>
    %21 = vector.broadcast %20 : i32 to vector<32x16xi32>
    %22 = arith.cmpi slt, %18, %21 : vector<32x16xi32>
    %c0_7 = arith.constant 0 : index
    %c0_8 = arith.constant 0 : index
    %23 = vector.load %arg12[%c0_7, %c0_8] : memref<32x1xf32, #tpu.memory_space<vmem>>, vector<32x1xf32>
    %24 = math.exp %14 : vector<32x16xf32>
    %cst_9 = arith.constant 0.000000e+00 : f32
    %25 = vector.broadcast %cst_9 : f32 to vector<32x16xf32>
    %26 = arith.select %22, %24, %25 : vector<32x16xi1>, vector<32x16xf32>
    %cst_10 = arith.constant dense<0.000000e+00> : vector<32xf32>
    %27 = vector.multi_reduction <add>, %26, %cst_10 [1] : vector<32x16xf32> to vector<32xf32>
    %28 = vector.shape_cast %27 : vector<32xf32> to vector<32x1xf32>
    %29 = arith.addf %23, %28 : vector<32x1xf32>
    %c0_11 = arith.constant 0 : index
    %c0_12 = arith.constant 0 : index
    %30 = vector.load %arg12[%c0_11, %c0_12] : memref<32x1xf32, #tpu.memory_space<vmem>>, vector<32x1xf32>
    tpu.vector_store %arg12[%c0_11, %c0_12], %29 {strides = array<i32>} : memref<32x1xf32, #tpu.memory_space<vmem>>, vector<32x1xf32>,
    %c2_i32 = arith.constant 2 : i32
    %31 = arith.cmpi eq, %arg1, %c2_i32 : i32
    %32 = arith.extui %31 : i1 to i32
    %c0_i32_13 = arith.constant 0 : i32
    %33 = arith.cmpi ne, %32, %c0_i32_13 : i32
    scf.if %33 {
      %c0_14 = arith.constant 0 : index
      %c0_15 = arith.constant 0 : index
      %34 = vector.load %arg12[%c0_14, %c0_15] : memref<32x1xf32, #tpu.memory_space<vmem>>, vector<32x1xf32>
      %35 = math.log %34 : vector<32x1xf32>
      %c0_16 = arith.constant 0 : index
      %c0_17 = arith.constant 0 : index
      %36 = vector.load %arg11[%c0_16, %c0_17] : memref<32x1xf32, #tpu.memory_space<vmem>>, vector<32x1xf32>
      %37 = arith.subf %35, %36 : vector<32x1xf32>
      %38 = tpu.iota {dimensions = array<i32: 0>} : vector<32x1xi32>
      %39 = arith.index_cast %arg0 : i32 to index
      %40 = memref.load %arg2[%39] : memref<3xi32, #tpu.memory_space<smem>>
      %41 = vector.broadcast %40 : i32 to vector<32x1xi32>
      %42 = arith.cmpi slt, %38, %41 : vector<32x1xi32>
      %cst_18 = arith.constant 0.000000e+00 : f32
      %43 = vector.broadcast %cst_18 : f32 to vector<32x1xf32>
      %44 = arith.select %42, %37, %43 : vector<32x1xi1>, vector<32x1xf32>
      %45 = vector.shape_cast %44 : vector<32x1xf32> to vector<1x32x1xf32>
      %cst_19 = arith.constant dense<0.000000e+00> : vector<1xf32>
      %46 = vector.multi_reduction <add>, %45, %cst_19 [1, 2] : vector<1x32x1xf32> to vector<1xf32>
      %47 = vector.shape_cast %46 : vector<1xf32> to vector<1x1x1xf32>
      %48 = vector.extract %47[0, 0, 0] : f32 from vector<1x1x1xf32>
      %49 = arith.sitofp %40 : i32 to f32
      %50 = arith.divf %48, %49 : f32
      %cst_20 = arith.constant 0.000000e+00 : f32
      %51 = vector.broadcast %cst_20 : f32 to vector<1x1x128xf32>
      %52 = vector.broadcast %50 : f32 to vector<1x1x128xf32>
      %53 = arith.addf %51, %52 : vector<1x1x128xf32>
      %c0_21 = arith.constant 0 : index
      %c0_22 = arith.constant 0 : index
      %c0_23 = arith.constant 0 : index
      %54 = vector.load %arg9[%c0_21, %c0_22, %c0_23] : memref<1x1x128xf32, #tpu.memory_space<vmem>>, vector<1x1x128xf32>
      tpu.vector_store %arg9[%c0_21, %c0_22, %c0_23], %53 {strides = array<i32>} : memref<1x1x128xf32, #tpu.memory_space<vmem>>, vector<1x1x128xf32>,
    } else {
    }
    return
  }
  func.func @transform_0(%arg0: i32, %arg1: i32, %arg2: memref<3xi32, #tpu.memory_space<smem>>, %arg3: memref<3xi32, #tpu.memory_space<smem>>) -> (i32, i32, i32) {
    %c0_i32 = arith.constant 0 : i32
    %c0_i32_0 = arith.constant 0 : i32
    %c0_i32_1 = arith.constant 0 : i32
    return %arg0, %c0_i32, %c0_i32_0 : i32, i32, i32
  }
  func.func @transform_1(%arg0: i32, %arg1: i32, %arg2: memref<3xi32, #tpu.memory_space<smem>>, %arg3: memref<3xi32, #tpu.memory_space<smem>>) -> (i32, i32, i32) {
    %c0_i32 = arith.constant 0 : i32
    %c0_i32_0 = arith.constant 0 : i32
    %c0_i32_1 = arith.constant 0 : i32
    return %arg0, %c0_i32, %c0_i32_0 : i32, i32, i32
  }
  func.func @transform_2(%arg0: i32, %arg1: i32, %arg2: memref<3xi32, #tpu.memory_space<smem>>, %arg3: memref<3xi32, #tpu.memory_space<smem>>) -> (i32, i32, i32) {
    %c0_i32 = arith.constant 0 : i32
    %c0_i32_0 = arith.constant 0 : i32
    return %arg0, %arg1, %c0_i32 : i32, i32, i32
  }
  func.func @transform_3(%arg0: i32, %arg1: i32, %arg2: memref<3xi32, #tpu.memory_space<smem>>, %arg3: memref<3xi32, #tpu.memory_space<smem>>) -> (i32, i32) {
    %c0_i32 = arith.constant 0 : i32
    %c0_i32_0 = arith.constant 0 : i32
    %c0_i32_1 = arith.constant 0 : i32
    return %c0_i32, %c0_i32_0 : i32, i32
  }
  func.func @transform_4(%arg0: i32, %arg1: i32, %arg2: memref<3xi32, #tpu.memory_space<smem>>, %arg3: memref<3xi32, #tpu.memory_space<smem>>) -> (i32, i32) {
    %c0_i32 = arith.constant 0 : i32
    %c0_i32_0 = arith.constant 0 : i32
    %c0_i32_1 = arith.constant 0 : i32
    return %c0_i32, %c0_i32_0 : i32, i32
  }
  func.func @transform_5(%arg0: i32, %arg1: i32, %arg2: memref<3xi32, #tpu.memory_space<smem>>, %arg3: memref<3xi32, #tpu.memory_space<smem>>) -> (i32, i32, i32) {
    %c0_i32 = arith.constant 0 : i32
    %c0_i32_0 = arith.constant 0 : i32
    %c0_i32_1 = arith.constant 0 : i32
    return %arg0, %c0_i32, %c0_i32_0 : i32, i32, i32
  }
}

</mosaic_0001>

<bundles_post_ra>
// kernel: tpu_custom_call.1
= control target key start
LH: loop header
LB: loop body
LE: loop exit
PB: predicated region body
PF: predicated region fallthrough
CT: control target
= control target key end

     0   :  { %s1127_s30 = smov [#allocation6]   ;;  %s1128_s8 = smov [#allocation7]   ;;  %s1496_s0 = inlined_call_operand.vmem [shape: s32[3], index: 0, kind: input, shape index: {}]   ;;  %s1497_s2 = inlined_call_operand.vmem [shape: f32[3,32,32], index: 2, kind: input, shape index: {}]   ;;  %s1498_s3 = inlined_call_operand.vmem [shape: f32[3,32,32], index: 3, kind: input, shape index: {}]   ;;  %s1499_s4 = inlined_call_operand.vmem [shape: f32[3,48,32], index: 4, kind: input, shape index: {}]   ;;  %s1500_s5 = inlined_call_operand.vmem [shape: f32[32,32], index: 5, kind: input, shape index: {}]   ;;  %s1501_s6 = inlined_call_operand.vmem [shape: f32[1,32], index: 6, kind: input, shape index: {}]   ;;  %s1502_s7 = inlined_call_operand.hbm [shape: f32[3,1,128], index: 7, kind: output, shape index: {}]   ;;  %s1503_s1 = inlined_call_operand.vmem [shape: s32[3], index: 1, kind: input, shape index: {}]  }
   0x1   :  { %s13_s26 = sshll.u32 %s1496_s0, 4  ;;  %s18_s29 = sshll.u32 %s1503_s1, 4  ;;  %s14_s26 = int_to_ptr.vmem [resolvable:$true] %s13_s26  ;;  %s19_s29 = int_to_ptr.vmem [resolvable:$true] %s18_s29 }
   0x2   :  { %16 = dma.vmem_to_smem %s14_s26, 16, %s1127_s30, [#allocation5] }
   0x3   :  { %21 = dma.vmem_to_smem %s19_s29, 16, %s1128_s8, [#allocation5] }
   0x4   :  { %1089 = dma.done.wait [#allocation5], 32 }
   0x5   :  { %1090 = vsyncadd [#allocation5], 4294967264 }
   0x6   :  { %24 = sfence }
   0x7   :  { %25 = vsyncpa [#allocation9], 0 }
   0x8   :  { %27 = vsyncpa [#allocation9 + $0x1], 0  ;;  %s1176_s9 = smov 0   ;;  %s1178_s10 = smov 0  }
   0x9   :  { %s1180_s0 = smov 0   ;;  %s1182_s11 = smov 0  }
   0xa   :  { %s1184_s1 = smov 0   ;;  %s1186_s12 = smov 0  }
   0xb   :  { %s1188_s13 = smov 0   ;;  %s1190_s14 = smov 0  }
   0xc LB: > { %1507 = sst [smem:[#allocation12_spill]] %s1117_s12  ;;  %s841_s15 = sadd.s32 4294967295, %s1125_s14   ;;  %s1125_s14 = sphi %s1190_s14, %s33_s14   ;;  %s1121_s13 = sphi %s1188_s13, %s1524_s13   ;;  %s1117_s12 = sphi %s1186_s12, %s1523_s12   ;;  %s1113_s1 = sphi %s1184_s1, %s1522_s1   ;;  %s1109_s11 = sphi %s1182_s11, %s1521_s11   ;;  %s1105_s0 = sphi %s1180_s0, %s1527_s0   ;;  %s1101_s10 = sphi %s1178_s10, %s1526_s10   ;;  %s1097_s9 = sphi %s1176_s9, %s1525_s9  }
   0xd   : > { %1508 = sst [smem:[#allocation13_spill]] %s1121_s13  ;;  %s842_s16 = sadd.s32 4294967294, %s1125_s14  }
   0xe   : > { %s42_s17 = sadd.s32 1, %s1117_s12  ;;  %s45_s18 = sadd.s32 1, %s1121_s13 }
   0xf   : > { %p43_p0 = scmp.ge.s32.totalorder %s42_s17, 3  ;;  %p184_p1 = scmp.ne.s32.totalorder %s1105_s0, %s1101_s10 }
  0x10   : > { %p185_p2 = scmp.eq.s32.totalorder %s841_s15, 8  ;;  %p190_p4 = scmp.ne.s32.totalorder %s1101_s10, %s1097_s9 }
  0x11   : > { %s1529_s17 = smov (%p43_p0, %s42_s17), 0  ;;  %s1531_s18 = smov (!%p43_p0, %s45_s18), %s1121_s13 }
  0x12   : > { %1509 = sst [smem:[#allocation14_spill]] %s1529_s17  ;;  %p1225_p3 = por %p185_p2, %p184_p1 }
  0x13   : > { %p47_p5 = scmp.ge.s32.totalorder %s1531_s18, 3  ;;  %p191_p6 = scmp.eq.s32.totalorder %s842_s16, 8 }
  0x14   : > { %p845_p7 = scmp.ge.s32.totalorder %s1125_s14, 1  ;;  %p244_p8 = scmp.lt.s32.totalorder %s1125_s14, 10 }
  0x15   : > { %s1533_s18 = smov (%p47_p5, %s1531_s18), 0  ;;  %p1235_p9 = por %p191_p6, %p190_p4 }
  0x16   : > { %1511 = sst [smem:[#allocation15_spill]] %s1533_s18  ;;  %p245_p10 = pnand %p845_p7, %p244_p8 }
  0x17   : > { %s171_s21 = ssub.s32 %s1121_s13, %s1533_s18  ;;  %s174_s22 = sadd.s32 1, %s1105_s0 }
  0x18   : > { %p172_p11 = scmp.eq.s32.totalorder %s171_s21, 0  ;;  %248 = sbr.rel (%p245_p10) target bundleno = 1101 (0x44d), region = 40 }
  0x19   : > { %p285_p12 = scmp.lt.s32.totalorder (!%p245_p10), %s1113_s1, 2  ;;  %s850_s25 = sshll.u32 (!%p245_p10), %s1109_s11, 1 }
  0x1a   : > { %s1243_s23 = scalar_select %p172_p11, %s1105_s0, %s174_s22  }
  0x1b   : > { %p298_p13 = scmp.lt.s32.totalorder (!%p245_p10), %s850_s25, 5  ;;  %s1513_s12 = sand.u32 (!%p245_p10), 1, %s1101_s10  }
  0x1c   : > { %p852_p0 = scmp.ne.s32.totalorder (!%p245_p10), %s1109_s11, 0 }
  0x1d   : > { %s286_s26 = scalar_select %p285_p12, %s1113_s1, 2 }
  0x1e   : > { %s1535_s25 = smov (!%p298_p13, %s850_s25), 5 }
  0x1f   : > { %s867_s27 = sshll.u32 %s286_s26, 5  ;;  %s887_s28 = smul.u32 6, %s286_s26 }
  0x20   : > { %s1252_s8 = scalar_lea.vmem %s1497_s2, %s867_s27  ;;  %s1257_s21 = scalar_lea.vmem %s1498_s3, %s867_s27 }
  0x21   : > { %s301_s22 = sadd.s32 %s887_s28, %s1535_s25  ;;  %s1266_s26 = scalar_lea.vmem [#allocation8], %s1513_s12 }
  0x22   : > { %s851_s18 = sshll.u32 %s301_s22, 3  ;;  %308 = sbr.rel (%p852_p0) target bundleno = 458 (0x1ca), region = 44 }
  0x23   : > { %s1262_s13 = scalar_lea.vmem %s1499_s4, %s851_s18 }
  0x27   : > { %v320_v0 = vld [vmem:[%s1500_s5 + $0x18] sm:$0xff]  ;;  %v319_v1 = vld [vmem:[%s1500_s5 + $0x10] sm:$0xff]  ;;  %v318_v2 = vld [vmem:[%s1500_s5 + $0x8] sm:$0xff]  ;;  %vm325_vm0 = vcmask 261120   ;;  %vm515_vm8 = vcmask 7168  }
  0x28   : > { %350 = vmatpush.msra.mxu0 %v320_v0  ;;  %870 = vmatpush.msra.mxu2 %v320_v0  ;;  %v317_v3 = vld [vmem:[%s1500_s5] sm:$0xff]  ;;  %v311_v5 = vld [vmem:[%s1252_s8 + $0x10] sm:$0xff]  ;;  %v310_v6 = vld [vmem:[%s1252_s8 + $0x8] sm:$0xff] }
  0x29   : > { %869 = vmatpush.msra.mxu1 %v320_v0  ;;  %871 = vmatpush.msra.mxu3 %v320_v0  ;;  %v309_v4 = vld [vmem:[%s1252_s8] sm:$0xff]  ;;  %v312_v7 = vld [vmem:[%s1252_s8 + $0x18] sm:$0xff]  ;;  %v1296_v11 = vld [vmem:[%s1257_s21 + $0x8] sm:$0xff] }
  0x2a   : > { %351 = vmatpush.msra.mxu0 %v319_v1  ;;  %873 = vmatpush.msra.mxu2 %v319_v1  ;;  %v1290_v8 = vld [vmem:[%s1257_s21] sm:$0xff]  ;;  %v428_v12 = vmul.f32 %v1296_v11, %v1296_v11  ;;  %v1322_v29 = vld [vmem:[%s1257_s21 + $0x10] sm:$0xff]  ;;  %v1330_v33 = vld [vmem:[%s1257_s21 + $0x18] sm:$0xff] }
  0x2b   : > { %872 = vmatpush.msra.mxu1 %v319_v1  ;;  %874 = vmatpush.msra.mxu3 %v319_v1  ;;  %v427_v9 = vmul.f32 %v1290_v8, %v1290_v8  ;;  %v966_v14 = vld [vmem:[%s1501_s6] ss:$0 sm:$0xff]  ;;  %v429_v31 = vmul.f32 %v1322_v29, %v1322_v29  ;;  %v430_v35 = vmul.f32 %v1330_v33, %v1330_v33 }
  0x2c   : > { %352 = vmatpush.msra.mxu0 %v318_v2  ;;  %876 = vmatpush.msra.mxu2 %v318_v2  ;;  %v434_v13 = vsel %vm325_vm0, %v428_v12, 0.0 }
  0x2d   : > { %875 = vmatpush.msra.mxu1 %v318_v2  ;;  %877 = vmatpush.msra.mxu3 %v318_v2  ;;  %v431_v10 = vsel %vm325_vm0, %v427_v9, 0.0  ;;  %v437_v34 = vsel %vm325_vm0, %v429_v31, 0.0  ;;  %v440_v36 = vsel %vm325_vm0, %v430_v35, 0.0 }
  0x2e   : > { %353 = vmatpush.msra.mxu0 %v317_v3  ;;  %879 = vmatpush.msra.mxu2 %v317_v3 }
  0x2f   : > { %853 = vmatmul.msk.f32.vlgmr.msra.gmra.mxu0 %vm325_vm0, %v309_v4  ;;  %855 = vmatmul.msk.f32.vlgmr.msra.gmra.mxu2 %vm325_vm0, %v311_v5 }
  0x30   : > { %878 = vmatpush.msra.mxu1 %v317_v3  ;;  %880 = vmatpush.msra.mxu3 %v317_v3 }
  0x31   : > { %854 = vmatmul.msk.f32.vlgmr.msra.gmra.mxu1 %vm325_vm0, %v310_v6  ;;  %856 = vmatmul.msk.f32.vlgmr.msra.gmra.mxu3 %vm325_vm0, %v312_v7 }
  0x32   : > { %432 = vadd.xlane.f32.xlu2 %v431_v10 }
  0x3a   : > { %435 = vadd.xlane.f32.xlu2 %v434_v13 }
  0xa5   : > { %v433_v37 = vpop.xlane.xlu2 %432 }
  0xa6   : > { %v443_v38 = vmax.f32 %v433_v37, 1e-24 }
  0xa8   : > { %967 = vrsqrt.f32 %v443_v38  ;;  %vm453_vm1 = vweird.f32 %v443_v38 }
  0xac   : > { %v355_v15 = vpop.f32.mrf.mxu0 }
  0xad   : > { %v1304_v16 = vadd.f32 %v966_v14, %v355_v15  ;;  %v436_v39 = vpop.xlane.xlu2 %435  ;;  %v1129_v15 = vmov 0.0  }
  0xae   : > { %v358_v17 = vpop.f32.mrf.mxu1  ;;  %v444_v40 = vmax.f32 %v436_v39, 1e-24  ;;  %v968_v41 = vpop.eup %967  ;;  %520 = vst.msk [vmem:[#allocation4] sm:$0xff] %vm515_vm8, %v1129_v15 }
  0xaf   : > { %v367_v18 = vmul.f32 %v1304_v16, %v1304_v16  ;;  %v1308_v19 = vadd.f32 %v966_v14, %v358_v17  ;;  %v448_v42 = vmul.f32 %v968_v41, %v443_v38  ;;  %vm454_vm2 = vweird.f32 %v968_v41  ;;  %521 = vst.msk [vmem:[#allocation4 + $0x8] sm:$0xff] %vm515_vm8, %v1129_v15 }
  0xb0   : > { %969 = vrsqrt.f32 %v444_v40  ;;  %vm1346_vm3 = vmor %vm453_vm1, %vm454_vm2  ;;  %vm463_vm4 = vweird.f32 %v444_v40  ;;  %522 = vst.msk [vmem:[#allocation4 + $0x10] sm:$0xff] %vm515_vm8, %v1129_v15 }
  0xb1   : > { %v371_v20 = vsel %vm325_vm0, %v367_v18, 0.0  ;;  %v368_v23 = vmul.f32 %v1308_v19, %v1308_v19  ;;  %v449_v44 = vmul.f32 %v968_v41, %v448_v42  ;;  %523 = vst.msk [vmem:[#allocation4 + $0x18] sm:$0xff] %vm515_vm8, %v1129_v15 }
  0xb2   : > { %v361_v21 = vpop.f32.mrf.mxu2  ;;  %372 = vadd.xlane.f32.xlu0 %v371_v20 }
  0xb3   : > { %v1311_v22 = vadd.f32 %v966_v14, %v361_v21  ;;  %v374_v28 = vsel %vm325_vm0, %v368_v23, 0.0  ;;  %v450_v48 = vmul.f32 0.5, %v449_v44 }
  0xb4   : > { %v364_v24 = vpop.f32.mrf.mxu3 }
  0xb5   : > { %v369_v25 = vmul.f32 %v1311_v22, %v1311_v22  ;;  %v1317_v26 = vadd.f32 %v966_v14, %v364_v24  ;;  %v451_v51 = vsub.f32 1.5, %v450_v48 }
  0xb6   : > { %v1336_v43 = vpop.eup %969 }
  0xb7   : > { %v377_v27 = vsel %vm325_vm0, %v369_v25, 0.0  ;;  %v370_v30 = vmul.f32 %v1317_v26, %v1317_v26  ;;  %v458_v47 = vmul.f32 %v1336_v43, %v444_v40  ;;  %v452_v58 = vmul.f32 %v968_v41, %v451_v51 }
  0xb8   : > { %378 = vadd.xlane.f32.xlu1 %v377_v27  ;;  %vm464_vm5 = vweird.f32 %v1336_v43 }
  0xb9   : > { %v380_v32 = vsel %vm325_vm0, %v370_v30, 0.0  ;;  %v459_v50 = vmul.f32 %v1336_v43, %v458_v47  ;;  %v456_v2 = vsel %vm1346_vm3, %v968_v41, %v452_v58  ;;  %vm1359_vm9 = vmor %vm463_vm4, %vm464_vm5 }
  0xba   : > { %375 = vadd.xlane.f32.xlu0 %v374_v28  ;;  %v491_v17 = vmul.f32 %v456_v2, %v1290_v8 }
  0xbb   : > { %v460_v57 = vmul.f32 0.5, %v459_v50 }
  0xbd   : > { %v461_v62 = vsub.f32 1.5, %v460_v57 }
  0xbf   : > { %v462_v14 = vmul.f32 %v1336_v43, %v461_v62 }
  0xc0   : > { %381 = vadd.xlane.f32.xlu1 %v380_v32 }
  0xc1   : > { %v466_v28 = vsel %vm1359_vm9, %v1336_v43, %v462_v14 }
  0xc2   : > { %438 = vadd.xlane.f32.xlu0 %v437_v34  ;;  %v492_v40 = vmul.f32 %v466_v28, %v1296_v11 }
  0xc8   : > { %441 = vadd.xlane.f32.xlu1 %v440_v36 }
 0x125   : > { %v373_v45 = vpop.xlane.xlu0 %372 }
 0x126   : > { %v383_v46 = vmax.f32 %v373_v45, 1e-24 }
 0x128   : > { %971 = vrsqrt.f32 %v383_v46  ;;  %vm393_vm6 = vweird.f32 %v383_v46 }
 0x12b   : > { %v379_v49 = vpop.xlane.xlu1 %378 }
 0x12c   : > { %v1340_v52 = vmax.f32 %v379_v49, 1e-24 }
 0x12d   : > { %v376_v53 = vpop.xlane.xlu0 %375 }
 0x12e   : > { %v972_v54 = vpop.eup %971  ;;  %973 = vrsqrt.f32 %v1340_v52  ;;  %v1343_v55 = vmax.f32 %v376_v53, 1e-24  ;;  %vm413_vm14 = vweird.f32 %v1340_v52 }
 0x12f   : > { %v388_v56 = vmul.f32 %v972_v54, %v383_v46  ;;  %vm394_vm7 = vweird.f32 %v972_v54 }
 0x130   : > { %975 = vrsqrt.f32 %v1343_v55  ;;  %vm395_vm10 = vmor %vm393_vm6, %vm394_vm7  ;;  %vm403_vm12 = vweird.f32 %v1343_v55 }
 0x131   : > { %v389_v60 = vmul.f32 %v972_v54, %v388_v56 }
 0x133   : > { %v390_v61 = vmul.f32 0.5, %v389_v60  ;;  %v382_v63 = vpop.xlane.xlu1 %381 }
 0x134   : > { %v974_v0 = vpop.eup %973  ;;  %v1351_v1 = vmax.f32 %v382_v63, 1e-24 }
 0x135   : > { %v391_v3 = vsub.f32 1.5, %v390_v61  ;;  %v408_v4 = vmul.f32 %v974_v0, %v1340_v52  ;;  %v439_v5 = vpop.xlane.xlu0 %438  ;;  %vm414_vm11 = vweird.f32 %v974_v0 }
 0x136   : > { %v976_v6 = vpop.eup %975  ;;  %977 = vrsqrt.f32 %v1351_v1  ;;  %v1357_v7 = vmax.f32 %v439_v5, 1e-24  ;;  %vm415_vm15 = vmor %vm413_vm14, %vm414_vm11  ;;  %vm423_vm3 = vweird.f32 %v1351_v1 }
 0x137   : > { %v409_v9 = vmul.f32 %v974_v0, %v408_v4  ;;  %v398_v12 = vmul.f32 %v976_v6, %v1343_v55  ;;  %v392_v13 = vmul.f32 %v972_v54, %v391_v3  ;;  %vm404_vm13 = vweird.f32 %v976_v6 }
 0x138   : > { %979 = vrsqrt.f32 %v1357_v7  ;;  %vm405_vm1 = vmor %vm403_vm12, %vm404_vm13  ;;  %vm473_vm4 = vweird.f32 %v1357_v7 }
 0x139   : > { %v410_v18 = vmul.f32 0.5, %v409_v9  ;;  %v399_v20 = vmul.f32 %v976_v6, %v398_v12  ;;  %v396_v21 = vsel %vm395_vm10, %v972_v54, %v392_v13 }
 0x13a   : > { %v487_v23 = vmul.f32 %v396_v21, %v1304_v16 }
 0x13b   : > { %v411_v24 = vsub.f32 1.5, %v410_v18  ;;  %v400_v25 = vmul.f32 0.5, %v399_v20  ;;  %v442_v27 = vpop.xlane.xlu1 %441 }
 0x13c   : > { %v978_v30 = vpop.eup %977  ;;  %v446_v8 = vmax.f32 %v442_v27, 1e-24  ;;  %v499_v31 = vmul.f32 %v491_v17, %v487_v23  ;;  %495 = vst.msk [vmem:[#allocation2] sm:$0xff] %vm325_vm0, %v487_v23 }
 0x13d   : > { %v401_v32 = vsub.f32 1.5, %v400_v25  ;;  %v418_v16 = vmul.f32 %v978_v30, %v1351_v1  ;;  %v412_v34 = vmul.f32 %v974_v0, %v411_v24  ;;  %vm424_vm2 = vweird.f32 %v978_v30 }
 0x13e   : > { %v980_v35 = vpop.eup %979  ;;  %981 = vrsqrt.f32 %v446_v8  ;;  %v503_v36 = vsel %vm325_vm0, %v499_v31, 0.0  ;;  %vm425_vm6 = vmor %vm423_vm3, %vm424_vm2  ;;  %vm483_vm10 = vweird.f32 %v446_v8 }
 0x13f   : > { %v419_v37 = vmul.f32 %v978_v30, %v418_v16  ;;  %v468_v38 = vmul.f32 %v980_v35, %v1357_v7  ;;  %504 = vadd.xlane.f32.xlu2 %v503_v36  ;;  %v402_v39 = vmul.f32 %v976_v6, %v401_v32  ;;  %v416_v41 = vsel %vm415_vm15, %v974_v0, %v412_v34 }
 0x140   : > { %v489_v45 = vmul.f32 %v416_v41, %v1311_v22  ;;  %vm474_vm5 = vweird.f32 %v980_v35 }
 0x141   : > { %v420_v42 = vmul.f32 0.5, %v419_v37  ;;  %v469_v43 = vmul.f32 %v980_v35, %v468_v38  ;;  %v406_v44 = vsel %vm405_vm1, %v976_v6, %v402_v39  ;;  %vm475_vm7 = vmor %vm473_vm4, %vm474_vm5 }
 0x142   : > { %v488_v46 = vmul.f32 %v406_v44, %v1308_v19  ;;  %497 = vst.msk [vmem:[#allocation2 + $0x10] sm:$0xff] %vm325_vm0, %v489_v45 }
 0x143   : > { %v421_v47 = vsub.f32 1.5, %v420_v42  ;;  %v470_v48 = vmul.f32 0.5, %v469_v43 }
 0x144   : > { %v982_v49 = vpop.eup %981  ;;  %v500_v50 = vmul.f32 %v492_v40, %v488_v46  ;;  %496 = vst.msk [vmem:[#allocation2 + $0x8] sm:$0xff] %vm325_vm0, %v488_v46 }
 0x145   : > { %v471_v11 = vsub.f32 1.5, %v470_v48  ;;  %v478_v51 = vmul.f32 %v982_v49, %v446_v8  ;;  %v422_v52 = vmul.f32 %v978_v30, %v421_v47  ;;  %vm484_vm9 = vweird.f32 %v982_v49 }
 0x146   : > { %v506_v19 = vsel %vm325_vm0, %v500_v50, 0.0  ;;  %vm485_vm11 = vmor %vm483_vm10, %vm484_vm9 }
 0x147   : > { %v479_v22 = vmul.f32 %v982_v49, %v478_v51  ;;  %507 = vadd.xlane.f32.xlu0 %v506_v19  ;;  %v472_v53 = vmul.f32 %v980_v35, %v471_v11  ;;  %v426_v54 = vsel %vm425_vm6, %v978_v30, %v422_v52 }
 0x148   : > { %v490_v55 = vmul.f32 %v426_v54, %v1317_v26 }
 0x149   : > { %v480_v56 = vmul.f32 0.5, %v479_v22  ;;  %v476_v57 = vsel %vm475_vm7, %v980_v35, %v472_v53 }
 0x14a   : > { %v493_v58 = vmul.f32 %v476_v57, %v1322_v29  ;;  %498 = vst.msk [vmem:[#allocation2 + $0x18] sm:$0xff] %vm325_vm0, %v490_v55 }
 0x14b   : > { %v481_v59 = vsub.f32 1.5, %v480_v56 }
 0x14c   : > { %v501_v60 = vmul.f32 %v493_v58, %v489_v45 }
 0x14d   : > { %v482_v61 = vmul.f32 %v982_v49, %v481_v59 }
 0x14e   : > { %v509_v62 = vsel %vm325_vm0, %v501_v60, 0.0 }
 0x14f   : > { %510 = vadd.xlane.f32.xlu1 %v509_v62  ;;  %v486_v63 = vsel %vm485_vm11, %v982_v49, %v482_v61 }
 0x150   : > { %v494_v0 = vmul.f32 %v486_v63, %v1330_v33 }
 0x152   : > { %v502_v1 = vmul.f32 %v494_v0, %v490_v55 }
 0x154   : > { %v512_v26 = vsel %vm325_vm0, %v502_v1, 0.0 }
 0x155   : > { %513 = vadd.xlane.f32.xlu2 %v512_v26 }
 0x1b2   : > { %v505_v2 = vpop.xlane.xlu2 %504 }
 0x1b3   : > { %516 = vst.msk [vmem:[#allocation3] sm:$0xff] %vm515_vm8, %v505_v2 }
 0x1ba   : > { %v508_v29 = vpop.xlane.xlu0 %507 }
 0x1bb   : > { %517 = vst.msk [vmem:[#allocation3 + $0x8] sm:$0xff] %vm515_vm8, %v508_v29 }
 0x1c2   : > { %v511_v3 = vpop.xlane.xlu1 %510 }
 0x1c3   : > { %518 = vst.msk [vmem:[#allocation3 + $0x10] sm:$0xff] %vm515_vm8, %v511_v3 }
 0x1c8   : > { %v514_v4 = vpop.xlane.xlu2 %513 }
 0x1c9   : > { %519 = vst.msk [vmem:[#allocation3 + $0x18] sm:$0xff] %vm515_vm8, %v514_v4 }
 0x1ca PF: > { %v525_v33 = vld [vmem:[%s1262_s13 + $0x8] sm:$0xff]  ;;  %vm528_vm12 = vcmask 261120   ;;  %v524_v6 = vld [vmem:[%s1262_s13] sm:$0xff]  ;;  %v561_v38 = vld [vmem:[#allocation2 + $0x10] sm:$0xff]  ;;  %v610_v40 = vlaneseq  ;;  %s615_s13 = sld [smem:[#allocation7 + %s1113_s1]]  ;;  %s863_s8 = sshll.u32 %s1109_s11, 4 }
 0x1cb   : > { %v527_v5 = vmul.f32 %v525_v33, %v525_v33  ;;  %v526_v9 = vmul.f32 %v524_v6, %v524_v6  ;;  %v559_v36 = vld [vmem:[#allocation2] sm:$0xff]  ;;  %v560_v37 = vld [vmem:[#allocation2 + $0x8] sm:$0xff]  ;;  %v562_v39 = vld [vmem:[#allocation2 + $0x18] sm:$0xff]  ;;  %v613_v44 = vstv %s863_s8  ;;  %vm634_vm3 = vcmask 130048   ;;  %p864_p1 = scmp.ne.s32.totalorder %s1109_s11, 2 }
 0x1cc   : > { %v611_v41 = vand.u32 127, %v610_v40  ;;  %v618_v63 = vld [vmem:[#allocation4] sm:$0xff]  ;;  %vm651_vm4 = vcmask 7168   ;;  %v620_v26 = vld [vmem:[#allocation4 + $0x10] sm:$0xff]  ;;  %v619_v2 = vld [vmem:[#allocation4 + $0x8] sm:$0xff]  ;;  %s1442_s16 = sld [smem:[#allocation6 + %s1113_s1]] (!%p864_p1) }
 0x1cd   : > { %v532_v7 = vsel %vm528_vm12, %v527_v5, 0.0  ;;  %v529_v10 = vsel %vm528_vm12, %v526_v9, 0.0  ;;  %v621_v5 = vld [vmem:[#allocation4 + $0x18] sm:$0xff] }
 0x1ce   : > { %533 = vadd.xlane.f32.xlu0 %v532_v7  ;;  %v614_v47 = vadd.s32 %v613_v44, %v611_v41 }
 0x1d0   : > { %v616_v48 = vstv %s615_s13 }
 0x1d1   : > { %vm1420_vm2 = vcmp.lt.s32.totalorder %v614_v47, %v616_v48 }
 0x1d2   : > { %s711_s11 = scvt.s32.f32 (!%p864_p1), %s1442_s16 }
 0x1d6   : > { %530 = vadd.xlane.f32.xlu0 %v529_v10 }
 0x241   : > { %v534_v12 = vpop.xlane.xlu0 %533 }
 0x242   : > { %v536_v13 = vmax.f32 %v534_v12, 1e-24 }
 0x244   : > { %983 = vrsqrt.f32 %v536_v13  ;;  %vm553_vm8 = vweird.f32 %v536_v13 }
 0x249   : > { %v531_v14 = vpop.xlane.xlu0 %530 }
 0x24a   : > { %v984_v15 = vpop.eup %983  ;;  %v535_v17 = vmax.f32 %v531_v14, 1e-24 }
 0x24b   : > { %v548_v18 = vmul.f32 %v984_v15, %v536_v13  ;;  %vm554_vm0 = vweird.f32 %v984_v15 }
 0x24c   : > { %985 = vrsqrt.f32 %v535_v17  ;;  %vm555_vm13 = vmor %vm553_vm8, %vm554_vm0  ;;  %vm543_vm15 = vweird.f32 %v535_v17 }
 0x24d   : > { %v549_v20 = vmul.f32 %v984_v15, %v548_v18 }
 0x24f   : > { %v550_v21 = vmul.f32 0.5, %v549_v20 }
 0x251   : > { %v551_v23 = vsub.f32 1.5, %v550_v21 }
 0x252   : > { %v986_v24 = vpop.eup %985 }
 0x253   : > { %v552_v25 = vmul.f32 %v984_v15, %v551_v23  ;;  %v538_v27 = vmul.f32 %v986_v24, %v535_v17  ;;  %vm544_vm14 = vweird.f32 %v986_v24 }
 0x254   : > { %vm545_vm1 = vmor %vm543_vm15, %vm544_vm14 }
 0x255   : > { %v556_v28 = vsel %vm555_vm13, %v984_v15, %v552_v25  ;;  %v539_v30 = vmul.f32 %v986_v24, %v538_v27 }
 0x256   : > { %v558_v8 = vmul.f32 %v556_v28, %v525_v33 }
 0x257   : > { %v540_v31 = vmul.f32 0.5, %v539_v30 }
 0x258   : > { %857 = vmatpush.xpose.msk.msra.mxu0 %vm528_vm12, %v558_v8  ;;  %881 = vmatpush.xpose.msk.msra.mxu1 %vm528_vm12, %v558_v8 }
 0x259   : > { %v541_v32 = vsub.f32 1.5, %v540_v31  ;;  %882 = vmatpush.xpose.msk.msra.mxu2 %vm528_vm12, %v558_v8  ;;  %883 = vmatpush.xpose.msk.msra.mxu3 %vm528_vm12, %v558_v8 }
 0x25b   : > { %v542_v16 = vmul.f32 %v986_v24, %v541_v32 }
 0x25d   : > { %v546_v34 = vsel %vm545_vm1, %v986_v24, %v542_v16 }
 0x25e   : > { %v557_v35 = vmul.f32 %v546_v34, %v524_v6 }
 0x260   : > { %858 = vmatpush.xpose.msk.msra.mxu0 %vm528_vm12, %v557_v35  ;;  %884 = vmatpush.xpose.msk.msra.mxu1 %vm528_vm12, %v557_v35 }
 0x261   : > { %885 = vmatpush.xpose.msk.msra.mxu2 %vm528_vm12, %v557_v35  ;;  %886 = vmatpush.xpose.msk.msra.mxu3 %vm528_vm12, %v557_v35 }
 0x263   : > { %859 = vmatmul.msk.f32.vlgmr.msra.gmra.mxu0 %vm528_vm12, %v559_v36  ;;  %860 = vmatmul.msk.f32.vlgmr.msra.gmra.mxu1 %vm528_vm12, %v560_v37 }
 0x264   : > { %861 = vmatmul.msk.f32.vlgmr.msra.gmra.mxu2 %vm528_vm12, %v561_v38  ;;  %862 = vmatmul.msk.f32.vlgmr.msra.gmra.mxu3 %vm528_vm12, %v562_v39 }
 0x2e0   : > { %v598_v42 = vpop.f32.mrf.mxu0  ;;  %v601_v43 = vpop.f32.mrf.mxu1 }
 0x2e1   : > { %v622_v45 = vmul.f32 1.442695, %v598_v42  ;;  %v624_v46 = vmul.f32 1.442695, %v601_v43 }
 0x2e3   : > { %987 = vpow2.f32 %v622_v45 }
 0x2e4   : > { %989 = vpow2.f32 %v624_v46 }
 0x2e7   : > { %v604_v49 = vpop.f32.mrf.mxu2  ;;  %v607_v50 = vpop.f32.mrf.mxu3 }
 0x2e8   : > { %v626_v51 = vmul.f32 1.442695, %v604_v49  ;;  %v628_v52 = vmul.f32 1.442695, %v607_v50 }
 0x2e9   : > { %v988_v19 = vpop.eup %987 }
 0x2ea   : > { %991 = vpow2.f32 %v626_v51  ;;  %v630_v22 = vsel %vm1420_vm2, %v988_v19, 0.0  ;;  %v990_v53 = vpop.eup %989 }
 0x2eb   : > { %v635_v54 = vsel %vm634_vm3, %v630_v22, 0.0  ;;  %993 = vpow2.f32 %v628_v52  ;;  %v631_v55 = vsel %vm1420_vm2, %v990_v53, 0.0 }
 0x2ec   : > { %636 = vadd.xlane.f32.xlu1 %v635_v54  ;;  %v638_v58 = vsel %vm634_vm3, %v631_v55, 0.0 }
 0x2f0   : > { %v992_v56 = vpop.eup %991 }
 0x2f1   : > { %v632_v57 = vsel %vm1420_vm2, %v992_v56, 0.0  ;;  %v994_v59 = vpop.eup %993 }
 0x2f2   : > { %v641_v60 = vsel %vm634_vm3, %v632_v57, 0.0  ;;  %v633_v61 = vsel %vm1420_vm2, %v994_v59, 0.0 }
 0x2f3   : > { %642 = vadd.xlane.f32.xlu2 %v641_v60  ;;  %v644_v62 = vsel %vm634_vm3, %v633_v61, 0.0 }
 0x2f4   : > { %639 = vadd.xlane.f32.xlu1 %v638_v58 }
 0x2fb   : > { %645 = vadd.xlane.f32.xlu2 %v644_v62 }
 0x35f   : > { %v637_v0 = vpop.xlane.xlu1 %636 }
 0x360   : > { %v647_v1 = vadd.f32 %v637_v0, %v618_v63 }
 0x362   : > { %652 = vst.msk [vmem:[#allocation4] sm:$0xff] %vm651_vm4, %v647_v1 }
 0x366   : > { %v643_v29 = vpop.xlane.xlu2 %642 }
 0x367   : > { %v649_v3 = vadd.f32 %v643_v29, %v620_v26  ;;  %v640_v4 = vpop.xlane.xlu1 %639 }
 0x368   : > { %v648_v33 = vadd.f32 %v640_v4, %v619_v2 }
 0x369   : > { %654 = vst.msk [vmem:[#allocation4 + $0x10] sm:$0xff] %vm651_vm4, %v649_v3 }
 0x36a   : > { %653 = vst.msk [vmem:[#allocation4 + $0x8] sm:$0xff] %vm651_vm4, %v648_v33 }
 0x36d   : > { %659 = sbr.rel (%p864_p1) target bundleno = 1087 (0x43f), region = 48 }
 0x36e   : > { %v646_v6 = vpop.xlane.xlu2 %645 }
 0x36f   : > { %v650_v7 = vadd.f32 %v646_v6, %v621_v5 }
 0x371   : > { %655 = vst.msk [vmem:[#allocation4 + $0x18] sm:$0xff] %vm651_vm4, %v650_v7 }
 0x372   : > { %v660_v9 = vld [vmem:[#allocation4] sm:$0xff]  ;;  %v661_v10 = vld [vmem:[#allocation4 + $0x8] sm:$0xff]  ;;  %v662_v12 = vld [vmem:[#allocation4 + $0x10] sm:$0xff]  ;;  %v681_v14 = vshrl.u32 %v610_v40, 7  ;;  %v686_v17 = vstv %s1442_s16  ;;  %v712_v50 = vstv %s711_s11 }
 0x373   : > { %995 = vlog2.f32 %v660_v9  ;;  %v672_v20 = vld [vmem:[#allocation3] sm:$0xff]  ;;  %v673_v25 = vld [vmem:[#allocation3 + $0x8] sm:$0xff]  ;;  %v674_v8 = vld [vmem:[#allocation3 + $0x10] sm:$0xff]  ;;  %vm718_vm10 = vweird.f32 %v712_v50  ;;  %v724_v55 = vand.u32 2147483648, %v712_v50  ;;  %v722_v57 = vand.u32 2147483647, %v712_v50 }
 0x374   : > { %997 = vlog2.f32 %v661_v10  ;;  %v682_v15 = vadd.s32 8, %v681_v14  ;;  %v683_v21 = vadd.s32 16, %v681_v14  ;;  %v684_v27 = vadd.s32 24, %v681_v14  ;;  %v675_v16 = vld [vmem:[#allocation3 + $0x18] sm:$0xff] }
 0x375   : > { %999 = vlog2.f32 %v662_v12  ;;  %vm687_vm5 = vcmp.lt.s32.totalorder %v681_v14, %v686_v17  ;;  %v725_v60 = vor.u32 1.1754944e-38, %v724_v55  ;;  %vm723_vm0 = vcmp.eq.f32.partialorder %v722_v57, 8.507059e+37 }
 0x376   : > { %vm688_vm6 = vcmp.lt.s32.totalorder %v682_v15, %v686_v17  ;;  %vm689_vm7 = vcmp.lt.s32.totalorder %v683_v21, %v686_v17  ;;  %vm690_vm9 = vcmp.lt.s32.totalorder %v684_v27, %v686_v17 }
 0x378   : > { %v663_v13 = vld [vmem:[#allocation4 + $0x18] sm:$0xff] }
 0x379   : > { %1001 = vlog2.f32 %v663_v13  ;;  %v996_v18 = vpop.eup %995 }
 0x37a   : > { %v998_v23 = vpop.eup %997  ;;  %v665_v24 = vmul.f32 0.6931472, %v996_v18  ;;  %1003 = vrcp.f32 %v712_v50 }
 0x37b   : > { %v1000_v28 = vpop.eup %999  ;;  %v667_v30 = vmul.f32 0.6931472, %v998_v23 }
 0x37c   : > { %v669_v32 = vmul.f32 0.6931472, %v1000_v28  ;;  %v676_v34 = vsub.f32 %v665_v24, %v672_v20 }
 0x37d   : > { %v677_v36 = vsub.f32 %v667_v30, %v673_v25 }
 0x37e   : > { %v678_v37 = vsub.f32 %v669_v32, %v674_v8  ;;  %v691_v38 = vsel %vm687_vm5, %v676_v34, 0.0 }
 0x37f   : > { %v1002_v31 = vpop.eup %1001  ;;  %v692_v40 = vsel %vm688_vm6, %v677_v36, 0.0  ;;  %v695_v41 = vsel %vm651_vm4, %v691_v38, 0.0 }
 0x380   : > { %v671_v35 = vmul.f32 0.6931472, %v1002_v31  ;;  %v693_v42 = vsel %vm689_vm7, %v678_v37, 0.0  ;;  %v696_v43 = vsel %vm651_vm4, %v692_v40, 0.0  ;;  %v1004_v11 = vpop.eup %1003 }
 0x381   : > { %v697_v45 = vadd.f32 %v696_v43, %v695_v41  ;;  %v698_v46 = vsel %vm651_vm4, %v693_v42, 0.0  ;;  %v714_v51 = vmul.f32 %v1004_v11, %v712_v50  ;;  %vm719_vm11 = vweird.f32 %v1004_v11 }
 0x382   : > { %v679_v39 = vsub.f32 %v671_v35, %v675_v16  ;;  %vm720_vm12 = vmor %vm718_vm10, %vm719_vm11 }
 0x383   : > { %v699_v48 = vadd.f32 %v698_v46, %v697_v45  ;;  %v715_v52 = vsub.f32 1.0, %v714_v51 }
 0x384   : > { %v694_v44 = vsel %vm690_vm9, %v679_v39, 0.0 }
 0x385   : > { %v700_v47 = vsel %vm651_vm4, %v694_v44, 0.0  ;;  %v716_v22 = vmul.f32 %v1004_v11, %v715_v52 }
 0x386   : > { %v701_v49 = vadd.f32 %v700_v47, %v699_v48 }
 0x387   : > { %v717_v56 = vadd.f32 %v1004_v11, %v716_v22 }
 0x388   : > { %702 = vadd.xlane.f32.xlu0 %v701_v49 }
 0x389   : > { %v721_v61 = vsel %vm720_vm12, %v1004_v11, %v717_v56 }
 0x38a   : > { %v726_v0 = vsel %vm723_vm0, %v725_v60, %v721_v61 }
 0x3fb   : > { %v703_v19 = vpop.xlane.xlu0 %702 }
 0x3fc   : > { %v704_v53 = vrot.slane %v703_v19, 4 }
 0x3fe   : > { %v705_v54 = vadd.f32 %v704_v53, %v703_v19 }
 0x400   : > { %v706_v58 = vrot.slane %v705_v54, 2 }
 0x402   : > { %v707_v59 = vadd.f32 %v706_v58, %v705_v54 }
 0x404   : > { %v708_v62 = vrot.slane %v707_v59, 1 }
 0x406   : > { %v709_v63 = vadd.f32 %v708_v62, %v707_v59 }
 0x408   : > { %888 = vpush %v709_v63 }
 0x409   : > { %890 = vpush %v726_v0 }
 0x439   : > { %s889_s21 = spop %888 }
 0x43a   : > { %s891_s22 = spop %890 }
 0x43b   : > { %s728_s29 = smul.f32 %s891_s22, %s889_s21 }
 0x43d   : > { %v729_v1 = vstv %s728_s29 }
 0x43e   : > { %731 = vst [vmem:[%s1266_s26] sm:$0x1] %v729_v1 }
 0x43f PF: > { %s741_s15 = scalar_lea.hbm %s1502_s7, %s1113_s1  ;;  %s743_s17 = sshll.u32 %s1266_s26, 4  ;;  %s744_s17 = int_to_ptr.vmem [resolvable:$true] %s743_s17 }
 0x440   : > { %s745_s18 = sshll.u32 %s741_s15, 4  ;;  %s1520_s12 = sand.u32 1, %s1101_s10   ;;  %s746_s18 = int_to_ptr.hbm [resolvable:$true] %s745_s18 }
 0x441   : > { %s733_s24 = scalar_lea.sflag [#allocation9], %s1520_s12  ;;  %s1043_s25 = sshra.s32 %s746_s18, 4  ;;  %s1044_s25 = int_to_ptr.hbm [resolvable:$true] %s1043_s25 }
 0x442   : > { %s1045_s28 = scalar_lea.hbm %s1044_s25, 1  ;;  %s1049_s16 = scalar_lea.hbm %s1502_s7, 3 }
 0x443   : > { %p1046_p2 = scmp.ne.s32.totalorder %s1044_s25, %s1045_s28  ;;  %p1050_p6 = scmp.lt.s32.totalorder %s1044_s25, %s1502_s7 }
 0x444   : > { %p1051_p7 = scmp.lt.s32.totalorder %s1049_s16, %s1045_s28 }
 0x445   : > { %p1047_p4 = pnand %p1046_p2, %p1225_p3 }
 0x446   : > { %p1052_p8 = por %p1051_p7, %p1050_p6 }
 0x447   : > { %p1048_p5 = pneg %p1047_p4 }
 0x449   : > { %p1053_p10 = pnand %p1052_p8, %p1048_p5 }
 0x44b   : > { %1056 = shalt.err (!%p1053_p10)
}
 0x44c   : > { %892 = dma.vmem_to_hbm [thread:$0]  (%p1225_p3), %s744_s17, 16, %s746_s18, %s733_s24  }
 0x44d PF: > { %p898_p11 = scmp.ge.s32.totalorder %s1125_s14, 2  ;;  %s757_s1 = sand.u32 1, %s1097_s9  }
 0x44e   : > { %s758_s26 = scalar_lea.sflag [#allocation9], %s757_s1 }
 0x44f   : > { %p895_p12 = pnand %p898_p11, %p1235_p9 }
 0x451   : > { %p896_p13 = pneg %p895_p12 }
 0x453   : > { %1092 = dma.done.wait (%p896_p13), %s758_s26, 16  }
 0x454   : > { %1094 = vsyncadd (%p896_p13), %s758_s26, 4294967280  ;;  %s33_s14 = sadd.s32 1, %s1125_s14   ;;  %s1521_s11 = sld [smem:[#allocation12_spill]] }
 0x455   : > { %p30_p0 = scmp.ge.s32.totalorder %s33_s14, 11   ;;  %s1522_s1 = sld [smem:[#allocation13_spill]] }
 0x456   : > { %s1523_s12 = sld [smem:[#allocation14_spill]]  ;;  %s1525_s9 = smov %s1101_s10 }
 0x457   : > { %s1524_s13 = sld [smem:[#allocation15_spill]]  ;;  %s1526_s10 = smov %s1105_s0 }
 0x458   : > { %s1527_s0 = smov %s1243_s23  ;;  %32 = sbr.rel (!%p30_p0) target bundleno = 12 (0xc), region = 89 }
 0x45d   :  { %763 = vsyncpa [#allocation9], 1 }
 0x45e   :  { %765 = vsyncpa [#allocation9 + $0x1], 1 }

</bundles_post_ra>
